<compile_context>
chip_gen: v7x
topology: tpu7x:2x2x1
jax: 0.10.0
libtpu: 0.0.40
codegen_flags: <defaults>
</compile_context>

<pallas_src>
import functools

import jax
import jax.numpy as jnp
from jax import lax
from jax.experimental import pallas as pl
from jax.experimental.pallas import tpu as pltpu


def _sepconv_kernel(x_ref, dww_ref, dwb_ref, pww_ref, pwb_ref, o_ref,
                    *, KH, KW, W, S, use_mxu):
    """One batch element (leading batch dim squeezed by the BlockSpec).

    x_ref  : (Cin, S + halo) flattened spatial + zero halo, halo=(KH-1)*W+(KW-1)
    dww_ref: (KH*KW, Cin, 1) depthwise weights, tap-major
    dwb_ref: (Cin, 1)        depthwise bias
    pww_ref: (Cout, Cin)     pointwise weights
    pwb_ref: (Cout, 1)       pointwise bias
    o_ref  : (Cout, S)       flattened output; positions with ho>=Ho or
                             wo>=Wo hold junk and are sliced off outside.
    """
    Cin = x_ref.shape[0]

    x = x_ref[...].astype(jnp.float32)                      # (Cin, S + halo)

    # Depthwise conv: each tap is a lane-shifted slice * per-channel weight,
    # accumulated with broadcast FMAs on the VPU (spatial = lane axis).
    acc = jnp.zeros((Cin, S), jnp.float32)
    for kh in range(KH):
        for kw in range(KW):
            off = kh * W + kw
            w_t = dww_ref[kh * KW + kw].astype(jnp.float32)  # (Cin, 1)
            acc = acc + x[:, off:off + S] * w_t
    acc = jnp.maximum(acc + dwb_ref[...].astype(jnp.float32), 0.0)

    # Pointwise 1x1 conv over channels.
    pww = pww_ref[...].astype(jnp.float32)                   # (Cout, Cin)
    if use_mxu:
        out = lax.dot_general(pww, acc, (((1,), (0,)), ((), ())),
                              preferred_element_type=jnp.float32)
    else:
        # Tiny channel counts: Cout x Cin broadcast FMAs on the VPU instead
        # of a nearly-empty MXU matmul.
        out = pww[:, 0:1] * acc[0:1, :]
        for ci in range(1, Cin):
            out = out + pww[:, ci:ci + 1] * acc[ci:ci + 1, :]
    out = out + pwb_ref[...].astype(jnp.float32)

    o_ref[...] = out.astype(o_ref.dtype)                     # dense (Cout, S)


def make_sepconv2d_pallas(N, Cin, Cout, Hp, Wp, KH=3, KW=3, *,
                          dtype=jnp.float32):
    """Builds the pallas_call for padded spatial size (Hp, Wp)."""
    S = Hp * Wp
    halo = (KH - 1) * Wp + (KW - 1)
    use_mxu = min(Cin, Cout) >= 64        # keep the MXU only for wide channels

    kernel = functools.partial(_sepconv_kernel, KH=KH, KW=KW, W=Wp, S=S,
                               use_mxu=use_mxu)

    return pl.pallas_call(
        kernel,
        out_shape=jax.ShapeDtypeStruct((N, Cout, S), dtype),
        grid_spec=pltpu.PrefetchScalarGridSpec(
            num_scalar_prefetch=0,
            grid=(N,),
            in_specs=[
                # Leading batch dim squeezed out of the kernel view.
                pl.BlockSpec((None, Cin, S + halo), lambda n: (n, 0, 0)),
                pl.BlockSpec((KH * KW, Cin, 1), lambda n: (0, 0, 0)),
                pl.BlockSpec((Cin, 1), lambda n: (0, 0)),
                pl.BlockSpec((Cout, Cin), lambda n: (0, 0)),
                pl.BlockSpec((Cout, 1), lambda n: (0, 0)),
            ],
            out_specs=pl.BlockSpec((None, Cout, S), lambda n: (n, 0, 0)),
        ),
        compiler_params=pltpu.CompilerParams(
            dimension_semantics=("parallel",)),
    )


def sepconv2d_forward(x_nchw, dw_w, dw_b, pw_w, pw_b, *, padding=0):
    """SepConv2d forward with PyTorch NCHW interface (stride=1, dilation=1).

    dw_w : (Cin, 1, KH, KW)   nn.Conv2d(groups=Cin) weight layout
    dw_b : (Cin,)
    pw_w : (Cout, Cin, 1, 1)  nn.Conv2d(kernel_size=1) weight layout
    pw_b : (Cout,)
    """
    N, Cin, H, W = x_nchw.shape
    Cout = pw_w.shape[0]
    KH, KW = dw_w.shape[2], dw_w.shape[3]

    if padding:
        x_nchw = jnp.pad(x_nchw, ((0, 0), (0, 0),
                                  (padding, padding), (padding, padding)))
    Hp, Wp = H + 2 * padding, W + 2 * padding
    Ho, Wo = Hp - KH + 1, Wp - KW + 1
    S = Hp * Wp
    halo = (KH - 1) * Wp + (KW - 1)

    # Flatten spatial onto the lane axis (free, contiguous) and append a
    # small zero halo so every depthwise tap is a fixed-length lane slice.
    x_flat = jnp.pad(x_nchw.reshape(N, Cin, S), ((0, 0), (0, 0), (0, halo)))

    # Parameter re-layout (tiny, one-time): per-channel values go on the
    # sublane axis with a broadcastable lane dim of 1.
    dww = jnp.transpose(dw_w[:, 0, :, :], (1, 2, 0)).reshape(KH * KW, Cin, 1)
    dwb = dw_b.reshape(Cin, 1)
    pww = pw_w[:, :, 0, 0]                                   # (Cout, Cin)
    pwb = pw_b.reshape(Cout, 1)

    run = make_sepconv2d_pallas(N, Cin, Cout, Hp, Wp, KH, KW,
                                dtype=x_nchw.dtype)
    out_flat = run(x_flat, dww, dwb, pww, pwb)               # (N, Cout, Hp*Wp)

    # Free reshape back to NCHW, then drop the junk columns/rows.
    return out_flat.reshape(N, Cout, Hp, Wp)[:, :, :Ho, :Wo]


def sepconv2d_reference(x_nchw, dw_w, dw_b, pw_w, pw_b, *, padding=0):
    """Pure-JAX reference (lax.conv) matching nn.Conv2d semantics."""
    Cin = x_nchw.shape[1]
    y = lax.conv_general_dilated(
        x_nchw, dw_w, window_strides=(1, 1),
        padding=[(padding, padding), (padding, padding)],
        dimension_numbers=("NCHW", "OIHW", "NCHW"),
        feature_group_count=Cin)
    y = jnp.maximum(y + dw_b.reshape(1, -1, 1, 1), 0.0)
    z = lax.conv_general_dilated(
        y, pw_w, window_strides=(1, 1), padding="VALID",
        dimension_numbers=("NCHW", "OIHW", "NCHW"))
    return z + pw_b.reshape(1, -1, 1, 1)


if __name__ == "__main__":
    # Shapes consistent with the module defaults: kernel_size=3, stride=1,
    # padding=0, dilation=1, depth_multiplier=1, bias=True.
    N, Cin, H, W = 2, 4, 16, 16
    Cout = 8
    KH = KW = 3

    key = jax.random.PRNGKey(0)
    k0, k1, k2, k3, k4 = jax.random.split(key, 5)

    x = jax.random.normal(k0, (N, Cin, H, W), dtype=jnp.float32)
    dw_w = jax.random.normal(k1, (Cin, 1, KH, KW), dtype=jnp.float32) * 0.2
    dw_b = jax.random.normal(k2, (Cin,), dtype=jnp.float32) * 0.1
    pw_w = jax.random.normal(k3, (Cout, Cin, 1, 1), dtype=jnp.float32) * 0.2
    pw_b = jax.random.normal(k4, (Cout,), dtype=jnp.float32) * 0.1

    out = jax.block_until_ready(sepconv2d_forward(x, dw_w, dw_b, pw_w, pw_b))
    ref = jax.block_until_ready(sepconv2d_reference(x, dw_w, dw_b, pw_w, pw_b))

    assert out.shape == (N, Cout, H - KH + 1, W - KW + 1), out.shape
    max_err = float(jnp.max(jnp.abs(out - ref)))
    assert jnp.allclose(out, ref, atol=1e-4, rtol=1e-4), max_err

    print("KERNEL_OK")
</pallas_src>

<mosaic_0001>
module attributes {stable_mosaic.version = 11 : i64} {
  func.func @_sepconv_kernel(%arg0: i32, %arg1: memref<1x4x290xf32, #tpu.memory_space<vmem>>, %arg2: memref<9x4x1xf32, #tpu.memory_space<vmem>>, %arg3: memref<4x1xf32, #tpu.memory_space<vmem>>, %arg4: memref<8x4xf32, #tpu.memory_space<vmem>>, %arg5: memref<8x1xf32, #tpu.memory_space<vmem>>, %arg6: memref<1x8x256xf32, #tpu.memory_space<vmem>>) attributes {dimension_semantics = [#tpu.dimension_semantics<parallel>], iteration_bounds = array<i64: 2>, scalar_prefetch = 0 : i64, scratch_operands = 0 : i64, tpu.core_type = #tpu.core_type<tc>, window_params = [{transform_indices = @transform_0, window_bounds = array<i64: 1, 4, 290>}, {pipeline_mode = #tpu.pipeline_mode<synchronous>, transform_indices = @transform_1, window_bounds = array<i64: 9, 4, 1>}, {pipeline_mode = #tpu.pipeline_mode<synchronous>, transform_indices = @transform_2, window_bounds = array<i64: 4, 1>}, {pipeline_mode = #tpu.pipeline_mode<synchronous>, transform_indices = @transform_3, window_bounds = array<i64: 8, 4>}, {pipeline_mode = #tpu.pipeline_mode<synchronous>, transform_indices = @transform_4, window_bounds = array<i64: 8, 1>}, {transform_indices = @transform_5, window_bounds = array<i64: 1, 8, 256>}]} {
    %c0 = arith.constant 0 : index
    %c0_0 = arith.constant 0 : index
    %c0_1 = arith.constant 0 : index
    %0 = vector.load %arg1[%c0, %c0_0, %c0_1] : memref<1x4x290xf32, #tpu.memory_space<vmem>>, vector<1x4x290xf32>
    %1 = vector.shape_cast %0 : vector<1x4x290xf32> to vector<4x290xf32>
    %cst = arith.constant 0.000000e+00 : f32
    %2 = vector.broadcast %cst : f32 to vector<4x256xf32>
    %c0_2 = arith.constant 0 : index
    %c0_3 = arith.constant 0 : index
    %c0_4 = arith.constant 0 : index
    %3 = vector.load %arg2[%c0_2, %c0_3, %c0_4] : memref<9x4x1xf32, #tpu.memory_space<vmem>>, vector<1x4x1xf32>
    %4 = vector.shape_cast %3 : vector<1x4x1xf32> to vector<4x1xf32>
    %5 = vector.extract_strided_slice %1 {offsets = [0, 0], sizes = [4, 256], strides = [1, 1]} : vector<4x290xf32> to vector<4x256xf32>
    %6 = vector.broadcast %4 : vector<4x1xf32> to vector<4x256xf32>
    %7 = arith.mulf %5, %6 : vector<4x256xf32>
    %8 = arith.addf %2, %7 : vector<4x256xf32>
    %c1 = arith.constant 1 : index
    %c0_5 = arith.constant 0 : index
    %c0_6 = arith.constant 0 : index
    %9 = vector.load %arg2[%c1, %c0_5, %c0_6] : memref<9x4x1xf32, #tpu.memory_space<vmem>>, vector<1x4x1xf32>
    %10 = vector.shape_cast %9 : vector<1x4x1xf32> to vector<4x1xf32>
    %11 = vector.extract_strided_slice %1 {offsets = [0, 1], sizes = [4, 256], strides = [1, 1]} : vector<4x290xf32> to vector<4x256xf32>
    %12 = vector.broadcast %10 : vector<4x1xf32> to vector<4x256xf32>
    %13 = arith.mulf %11, %12 : vector<4x256xf32>
    %14 = arith.addf %8, %13 : vector<4x256xf32>
    %c2 = arith.constant 2 : index
    %c0_7 = arith.constant 0 : index
    %c0_8 = arith.constant 0 : index
    %15 = vector.load %arg2[%c2, %c0_7, %c0_8] : memref<9x4x1xf32, #tpu.memory_space<vmem>>, vector<1x4x1xf32>
    %16 = vector.shape_cast %15 : vector<1x4x1xf32> to vector<4x1xf32>
    %17 = vector.extract_strided_slice %1 {offsets = [0, 2], sizes = [4, 256], strides = [1, 1]} : vector<4x290xf32> to vector<4x256xf32>
    %18 = vector.broadcast %16 : vector<4x1xf32> to vector<4x256xf32>
    %19 = arith.mulf %17, %18 : vector<4x256xf32>
    %20 = arith.addf %14, %19 : vector<4x256xf32>
    %c3 = arith.constant 3 : index
    %c0_9 = arith.constant 0 : index
    %c0_10 = arith.constant 0 : index
    %21 = vector.load %arg2[%c3, %c0_9, %c0_10] : memref<9x4x1xf32, #tpu.memory_space<vmem>>, vector<1x4x1xf32>
    %22 = vector.shape_cast %21 : vector<1x4x1xf32> to vector<4x1xf32>
    %23 = vector.extract_strided_slice %1 {offsets = [0, 16], sizes = [4, 256], strides = [1, 1]} : vector<4x290xf32> to vector<4x256xf32>
    %24 = vector.broadcast %22 : vector<4x1xf32> to vector<4x256xf32>
    %25 = arith.mulf %23, %24 : vector<4x256xf32>
    %26 = arith.addf %20, %25 : vector<4x256xf32>
    %c4 = arith.constant 4 : index
    %c0_11 = arith.constant 0 : index
    %c0_12 = arith.constant 0 : index
    %27 = vector.load %arg2[%c4, %c0_11, %c0_12] : memref<9x4x1xf32, #tpu.memory_space<vmem>>, vector<1x4x1xf32>
    %28 = vector.shape_cast %27 : vector<1x4x1xf32> to vector<4x1xf32>
    %29 = vector.extract_strided_slice %1 {offsets = [0, 17], sizes = [4, 256], strides = [1, 1]} : vector<4x290xf32> to vector<4x256xf32>
    %30 = vector.broadcast %28 : vector<4x1xf32> to vector<4x256xf32>
    %31 = arith.mulf %29, %30 : vector<4x256xf32>
    %32 = arith.addf %26, %31 : vector<4x256xf32>
    %c5 = arith.constant 5 : index
    %c0_13 = arith.constant 0 : index
    %c0_14 = arith.constant 0 : index
    %33 = vector.load %arg2[%c5, %c0_13, %c0_14] : memref<9x4x1xf32, #tpu.memory_space<vmem>>, vector<1x4x1xf32>
    %34 = vector.shape_cast %33 : vector<1x4x1xf32> to vector<4x1xf32>
    %35 = vector.extract_strided_slice %1 {offsets = [0, 18], sizes = [4, 256], strides = [1, 1]} : vector<4x290xf32> to vector<4x256xf32>
    %36 = vector.broadcast %34 : vector<4x1xf32> to vector<4x256xf32>
    %37 = arith.mulf %35, %36 : vector<4x256xf32>
    %38 = arith.addf %32, %37 : vector<4x256xf32>
    %c6 = arith.constant 6 : index
    %c0_15 = arith.constant 0 : index
    %c0_16 = arith.constant 0 : index
    %39 = vector.load %arg2[%c6, %c0_15, %c0_16] : memref<9x4x1xf32, #tpu.memory_space<vmem>>, vector<1x4x1xf32>
    %40 = vector.shape_cast %39 : vector<1x4x1xf32> to vector<4x1xf32>
    %41 = vector.extract_strided_slice %1 {offsets = [0, 32], sizes = [4, 256], strides = [1, 1]} : vector<4x290xf32> to vector<4x256xf32>
    %42 = vector.broadcast %40 : vector<4x1xf32> to vector<4x256xf32>
    %43 = arith.mulf %41, %42 : vector<4x256xf32>
    %44 = arith.addf %38, %43 : vector<4x256xf32>
    %c7 = arith.constant 7 : index
    %c0_17 = arith.constant 0 : index
    %c0_18 = arith.constant 0 : index
    %45 = vector.load %arg2[%c7, %c0_17, %c0_18] : memref<9x4x1xf32, #tpu.memory_space<vmem>>, vector<1x4x1xf32>
    %46 = vector.shape_cast %45 : vector<1x4x1xf32> to vector<4x1xf32>
    %47 = vector.extract_strided_slice %1 {offsets = [0, 33], sizes = [4, 256], strides = [1, 1]} : vector<4x290xf32> to vector<4x256xf32>
    %48 = vector.broadcast %46 : vector<4x1xf32> to vector<4x256xf32>
    %49 = arith.mulf %47, %48 : vector<4x256xf32>
    %50 = arith.addf %44, %49 : vector<4x256xf32>
    %c8 = arith.constant 8 : index
    %c0_19 = arith.constant 0 : index
    %c0_20 = arith.constant 0 : index
    %51 = vector.load %arg2[%c8, %c0_19, %c0_20] : memref<9x4x1xf32, #tpu.memory_space<vmem>>, vector<1x4x1xf32>
    %52 = vector.shape_cast %51 : vector<1x4x1xf32> to vector<4x1xf32>
    %53 = vector.extract_strided_slice %1 {offsets = [0, 34], sizes = [4, 256], strides = [1, 1]} : vector<4x290xf32> to vector<4x256xf32>
    %54 = vector.broadcast %52 : vector<4x1xf32> to vector<4x256xf32>
    %55 = arith.mulf %53, %54 : vector<4x256xf32>
    %56 = arith.addf %50, %55 : vector<4x256xf32>
    %c0_21 = arith.constant 0 : index
    %c0_22 = arith.constant 0 : index
    %57 = vector.load %arg3[%c0_21, %c0_22] : memref<4x1xf32, #tpu.memory_space<vmem>>, vector<4x1xf32>
    %58 = vector.broadcast %57 : vector<4x1xf32> to vector<4x256xf32>
    %59 = arith.addf %56, %58 : vector<4x256xf32>
    %cst_23 = arith.constant 0.000000e+00 : f32
    %60 = vector.broadcast %cst_23 : f32 to vector<4x256xf32>
    %61 = arith.maximumf %59, %60 : vector<4x256xf32>
    %c0_24 = arith.constant 0 : index
    %c0_25 = arith.constant 0 : index
    %62 = vector.load %arg4[%c0_24, %c0_25] : memref<8x4xf32, #tpu.memory_space<vmem>>, vector<8x4xf32>
    %63 = vector.extract_strided_slice %62 {offsets = [0, 0], sizes = [8, 1], strides = [1, 1]} : vector<8x4xf32> to vector<8x1xf32>
    %64 = vector.extract_strided_slice %61 {offsets = [0, 0], sizes = [1, 256], strides = [1, 1]} : vector<4x256xf32> to vector<1x256xf32>
    %65 = vector.broadcast %63 : vector<8x1xf32> to vector<8x256xf32>
    %66 = vector.broadcast %64 : vector<1x256xf32> to vector<8x256xf32>
    %67 = arith.mulf %65, %66 : vector<8x256xf32>
    %68 = vector.extract_strided_slice %62 {offsets = [0, 1], sizes = [8, 1], strides = [1, 1]} : vector<8x4xf32> to vector<8x1xf32>
    %69 = vector.extract_strided_slice %61 {offsets = [1, 0], sizes = [1, 256], strides = [1, 1]} : vector<4x256xf32> to vector<1x256xf32>
    %70 = vector.broadcast %68 : vector<8x1xf32> to vector<8x256xf32>
    %71 = vector.broadcast %69 : vector<1x256xf32> to vector<8x256xf32>
    %72 = arith.mulf %70, %71 : vector<8x256xf32>
    %73 = arith.addf %67, %72 : vector<8x256xf32>
    %74 = vector.extract_strided_slice %62 {offsets = [0, 2], sizes = [8, 1], strides = [1, 1]} : vector<8x4xf32> to vector<8x1xf32>
    %75 = vector.extract_strided_slice %61 {offsets = [2, 0], sizes = [1, 256], strides = [1, 1]} : vector<4x256xf32> to vector<1x256xf32>
    %76 = vector.broadcast %74 : vector<8x1xf32> to vector<8x256xf32>
    %77 = vector.broadcast %75 : vector<1x256xf32> to vector<8x256xf32>
    %78 = arith.mulf %76, %77 : vector<8x256xf32>
    %79 = arith.addf %73, %78 : vector<8x256xf32>
    %80 = vector.extract_strided_slice %62 {offsets = [0, 3], sizes = [8, 1], strides = [1, 1]} : vector<8x4xf32> to vector<8x1xf32>
    %81 = vector.extract_strided_slice %61 {offsets = [3, 0], sizes = [1, 256], strides = [1, 1]} : vector<4x256xf32> to vector<1x256xf32>
    %82 = vector.broadcast %80 : vector<8x1xf32> to vector<8x256xf32>
    %83 = vector.broadcast %81 : vector<1x256xf32> to vector<8x256xf32>
    %84 = arith.mulf %82, %83 : vector<8x256xf32>
    %85 = arith.addf %79, %84 : vector<8x256xf32>
    %c0_26 = arith.constant 0 : index
    %c0_27 = arith.constant 0 : index
    %86 = vector.load %arg5[%c0_26, %c0_27] : memref<8x1xf32, #tpu.memory_space<vmem>>, vector<8x1xf32>
    %87 = vector.broadcast %86 : vector<8x1xf32> to vector<8x256xf32>
    %88 = arith.addf %85, %87 : vector<8x256xf32>
    %c0_28 = arith.constant 0 : index
    %c0_29 = arith.constant 0 : index
    %c0_30 = arith.constant 0 : index
    %89 = vector.load %arg6[%c0_28, %c0_29, %c0_30] : memref<1x8x256xf32, #tpu.memory_space<vmem>>, vector<1x8x256xf32>
    %90 = vector.shape_cast %89 : vector<1x8x256xf32> to vector<8x256xf32>
    %91 = vector.shape_cast %88 : vector<8x256xf32> to vector<1x8x256xf32>
    tpu.vector_store %arg6[%c0_28, %c0_29, %c0_30], %91 {strides = array<i32>} : memref<1x8x256xf32, #tpu.memory_space<vmem>>, vector<1x8x256xf32>,
    return
  }
  func.func @transform_0(%arg0: i32) -> (i32, i32, i32) {
    %c0_i32 = arith.constant 0 : i32
    %c0_i32_0 = arith.constant 0 : i32
    %c0_i32_1 = arith.constant 0 : i32
    return %arg0, %c0_i32, %c0_i32_0 : i32, i32, i32
  }
  func.func @transform_1(%arg0: i32) -> (i32, i32, i32) {
    %c0_i32 = arith.constant 0 : i32
    %c0_i32_0 = arith.constant 0 : i32
    %c0_i32_1 = arith.constant 0 : i32
    %c0_i32_2 = arith.constant 0 : i32
    return %c0_i32, %c0_i32_0, %c0_i32_1 : i32, i32, i32
  }
  func.func @transform_2(%arg0: i32) -> (i32, i32) {
    %c0_i32 = arith.constant 0 : i32
    %c0_i32_0 = arith.constant 0 : i32
    %c0_i32_1 = arith.constant 0 : i32
    return %c0_i32, %c0_i32_0 : i32, i32
  }
  func.func @transform_3(%arg0: i32) -> (i32, i32) {
    %c0_i32 = arith.constant 0 : i32
    %c0_i32_0 = arith.constant 0 : i32
    %c0_i32_1 = arith.constant 0 : i32
    return %c0_i32, %c0_i32_0 : i32, i32
  }
  func.func @transform_4(%arg0: i32) -> (i32, i32) {
    %c0_i32 = arith.constant 0 : i32
    %c0_i32_0 = arith.constant 0 : i32
    %c0_i32_1 = arith.constant 0 : i32
    return %c0_i32, %c0_i32_0 : i32, i32
  }
  func.func @transform_5(%arg0: i32) -> (i32, i32, i32) {
    %c0_i32 = arith.constant 0 : i32
    %c0_i32_0 = arith.constant 0 : i32
    %c0_i32_1 = arith.constant 0 : i32
    return %arg0, %c0_i32, %c0_i32_0 : i32, i32, i32
  }
}

</mosaic_0001>

<bundles_post_ra>
// kernel: tpu_custom_call.1
= control target key start
LH: loop header
LB: loop body
LE: loop exit
PB: predicated region body
PF: predicated region fallthrough
CT: control target
= control target key end

     0   :  { %10 = vsyncpa [#allocation3], 0  ;;  %s1046_s0 = inlined_call_operand.vmem [shape: f32[2,4,290], index: 0, kind: input, shape index: {}]   ;;  %s1047_s1 = inlined_call_operand.vmem [shape: f32[9,4,1], index: 1, kind: input, shape index: {}]   ;;  %s1048_s2 = inlined_call_operand.vmem [shape: f32[4,1], index: 2, kind: input, shape index: {}]   ;;  %s1049_s3 = inlined_call_operand.vmem [shape: f32[8,4], index: 3, kind: input, shape index: {}]   ;;  %s1050_s4 = inlined_call_operand.vmem [shape: f32[8,1], index: 4, kind: input, shape index: {}]   ;;  %s1051_s5 = inlined_call_operand.hbm [shape: f32[2,8,256], index: 5, kind: output, shape index: {}]  }
   0x1   :  { %12 = vsyncpa [#allocation3 + $0x1], 0  ;;  %s865_s18 = smov 0   ;;  %s867_s19 = smov 0  }
   0x2   :  { %s869_s20 = smov 0   ;;  %s871_s21 = smov 0  }
   0x3 LB: > { %s886_s22 = sadd.s32 4294967295, %s819_s21   ;;  %s677_s23 = sadd.s32 4294967294, %s819_s21   ;;  %s819_s21 = sphi %s871_s21, %s1057_s21   ;;  %s815_s20 = sphi %s869_s20, %s1056_s20   ;;  %s811_s19 = sphi %s867_s19, %s1055_s19   ;;  %s807_s18 = sphi %s865_s18, %s1054_s18  }
   0x4   : > { %s890_s24 = sadd.s32 1, %s819_s21   ;;  %s135_s25 = sadd.s32 1, %s815_s20 }
   0x5   : > { %s132_s26 = ssub.s32 %s819_s21, %s890_s24  ;;  %p145_p0 = scmp.ne.s32.totalorder %s815_s20, %s811_s19 }
   0x6   : > { %p133_p1 = scmp.eq.s32.totalorder %s132_s26, 0  ;;  %p146_p2 = scmp.eq.s32.totalorder %s886_s22, 1 }
   0x7   : > { %p151_p3 = scmp.ne.s32.totalorder %s811_s19, %s807_s18  ;;  %p152_p4 = scmp.eq.s32.totalorder %s677_s23, 1 }
   0x8   : > { %s901_s27 = scalar_select %p133_p1, %s815_s20, %s135_s25  }
   0x9   : > { %p903_p5 = por %p146_p2, %p145_p0  ;;  %p907_p6 = por %p152_p4, %p151_p3 }
   0xa   : > { %p680_p7 = scmp.ge.s32.totalorder %s819_s21, 1  ;;  %p190_p8 = scmp.lt.s32.totalorder %s819_s21, 3 }
   0xc   : > { %p191_p9 = pnand %p680_p7, %p190_p8 }
   0xd   : > { %v685_v0 = vld [vmem:[%s1047_s1 + $0xc] sm:$0xf] (!%p191_p9)  ;;  %v683_v1 = vld [vmem:[%s1047_s1 + $0x4] sm:$0xf] (!%p191_p9)  ;;  %v821_v2 = vmov (!%p191_p9), 0   ;;  %v822_v11 = vmov (!%p191_p9), 1   ;;  %v233_v14 = vlaneseq (!%p191_p9) }
   0xe   : > { %194 = sbr.rel (%p191_p9) target bundleno = 334 (0x14e), region = 40  ;;  %751 = vset.pattern.permute.xlu1 (!%p191_p9), %v821_v2  ;;  %750 = vset.pattern.permute.xlu0 (!%p191_p9), %v821_v2  ;;  %v686_v3 = vld [vmem:[%s1047_s1 + $0x10] sm:$0xf] (!%p191_p9)  ;;  %v684_v4 = vld [vmem:[%s1047_s1 + $0x8] sm:$0xf] (!%p191_p9)  ;;  %p218_p10 = scmp.lt.s32.totalorder (!%p191_p9), %s886_s22, 1 }
   0xf   : > { %303 = vperm.xlu1 (!%p191_p9), %751, %v685_v0   ;;  %244 = vperm.xlu0 (!%p191_p9), %750, %v683_v1   ;;  %v688_v5 = vld [vmem:[%s1047_s1 + $0x18] sm:$0xf] (!%p191_p9)  ;;  %v687_v6 = vld [vmem:[%s1047_s1 + $0x14] sm:$0xf] (!%p191_p9)  ;;  %v690_v7 = vld [vmem:[%s1047_s1 + $0x20] sm:$0xf] (!%p191_p9) }
  0x10   : > { %v689_v8 = vld [vmem:[%s1047_s1 + $0x1c] sm:$0xf] (!%p191_p9)  ;;  %v473_v9 = vld [vmem:[%s1048_s2] sm:$0xf] (!%p191_p9)  ;;  %v823_v12 = vmov (!%p191_p9), 839922192  }
  0x11   : > { %v225_v10 = vld [vmem:[%s1047_s1] sm:$0xf] (!%p191_p9)  ;;  %v231_v13 = vunpack.c.l.s4 (!%p191_p9), %v823_v12  ;;  %v947_v16 = vshrl.u32 (!%p191_p9), %v233_v14, 7  ;;  %s824_s14 = smov (!%p191_p9), 127   ;;  %s825_s15 = smov (!%p191_p9), 126   ;;  %v832_v56 = vmov (!%p191_p9), 2  }
  0x12   : > { %s826_s16 = smov (!%p191_p9), 112   ;;  %s827_s17 = smov (!%p191_p9), 111   ;;  %v488_v55 = vld [vmem:[%s1049_s3] sm:$0xff] (!%p191_p9)  ;;  %v833_v57 = vmov (!%p191_p9), 3   ;;  %vm264_vm0 = vcmask (!%p191_p9), 1043456   ;;  %vm266_vm1 = vcmask (!%p191_p9), 1039360  }
  0x13   : > { %332 = vperm.xlu1 (!%p191_p9), %751, %v686_v3   ;;  %274 = vperm.xlu0 (!%p191_p9), %750, %v684_v4   ;;  %v232_v15 = vunpack.c.0.s8 (!%p191_p9), %v231_v13  ;;  %s828_s23 = smov (!%p191_p9), 110   ;;  %s829_s25 = smov (!%p191_p9), 96   ;;  %v593_v58 = vld [vmem:[%s1050_s4] sm:$0xff] (!%p191_p9)  ;;  %vm295_vm2 = vcmask (!%p191_p9), 1031168   ;;  %vm324_vm3 = vcmask (!%p191_p9), 916480   ;;  %vm353_vm4 = vcmask (!%p191_p9), 908288  }
  0x14   : > { %s830_s26 = smov (!%p191_p9), 95   ;;  %s831_s30 = smov (!%p191_p9), 94   ;;  %vm382_vm5 = vcmask (!%p191_p9), 900096   ;;  %vm411_vm6 = vcmask (!%p191_p9), 785408   ;;  %vm440_vm7 = vcmask (!%p191_p9), 777216   ;;  %vm469_vm8 = vcmask (!%p191_p9), 769024  }
  0x15   : > { %s219_s9 = scalar_select %p218_p10, %s886_s22, 1  ;;  %v950_v17 = vsub.s32 %v232_v15, %v947_v16 }
  0x16   : > { %s696_s12 = sshll.u32 %s886_s22, 8 }
  0x17   : > { %390 = vperm.xlu1 %751, %v688_v5   ;;  %361 = vperm.xlu0 %750, %v687_v6   ;;  %s697_s10 = smul.u32 12, %s219_s9 }
  0x19   : > { %s222_s13 = scalar_lea.vmem %s1046_s0, %s697_s10  ;;  %s215_s10 = sand.u32 1, %s811_s19  }
  0x1a   : > { %v223_v18 = vld [vmem:[%s222_s13] sm:$0xff]  ;;  %v224_v19 = vld [vmem:[%s222_s13 + $0x8] sm:$0xf]  ;;  %s681_s11 = sshll.u32 %s215_s10, 4  ;;  %s604_s22 = scalar_lea.sflag [#allocation3], %s215_s10 }
  0x1b   : > { %448 = vperm.xlu1 %751, %v690_v7   ;;  %419 = vperm.xlu0 %750, %v689_v8   ;;  %s217_s13 = scalar_lea.vmem [#allocation2], %s681_s11 }
  0x1f   : > { %476 = vperm.xlu1 %751, %v473_v9   ;;  %228 = vperm.xlu0 %750, %v225_v10  }
  0x23   : > { %752 = vset.pattern.permute.xlu1 %v822_v11 }
  0x8e   : > { %v245_v20 = vpop.permute.xlu0 %244  ;;  %v304_v24 = vpop.permute.xlu1 %303 }
  0x8f   : > { %v252_v21 = vrot.slane %v245_v20, %v950_v17  ;;  %v311_v26 = vrot.slane %v304_v24, %v950_v17 }
  0x91   : > { %v254_v22 = vmul.f32 %v252_v21, %v223_v18  ;;  %v255_v23 = vmul.f32 %v252_v21, %v224_v19  ;;  %v313_v31 = vmul.f32 %v311_v26, %v223_v18  ;;  %v314_v32 = vmul.f32 %v311_v26, %v224_v19 }
  0x92   : > { %v275_v25 = vpop.permute.xlu0 %274  ;;  %v333_v33 = vpop.permute.xlu1 %332 }
  0x93   : > { %v282_v27 = vrot.slane %v275_v25, %v950_v17  ;;  %260 = vrot.lane.b32.xlu0 %v255_v23, %s824_s14  ;;  %258 = vrot.lane.b32.xlu1 %v254_v22, %s824_s14  ;;  %v340_v34 = vrot.slane %v333_v33, %v950_v17  ;;  %s618_s14 = sshll.u32 %s217_s13, 4  ;;  %s1004_s14 = int_to_ptr.vmem [resolvable:$true] %s618_s14 }
  0x95   : > { %v284_v28 = vmul.f32 %v282_v27, %v223_v18  ;;  %v285_v29 = vmul.f32 %v282_v27, %v224_v19  ;;  %v342_v36 = vmul.f32 %v340_v34, %v223_v18  ;;  %v343_v37 = vmul.f32 %v340_v34, %v224_v19 }
  0x96   : > { %v362_v30 = vpop.permute.xlu0 %361  ;;  %v391_v39 = vpop.permute.xlu1 %390 }
  0x97   : > { %290 = vrot.lane.b32.xlu0 %v285_v29, %s825_s15  ;;  %288 = vrot.lane.b32.xlu1 %v284_v28, %s825_s15  ;;  %v369_v38 = vrot.slane %v362_v30, %v950_v17  ;;  %v398_v42 = vrot.slane %v391_v39, %v950_v17 }
  0x99   : > { %v371_v43 = vmul.f32 %v369_v38, %v223_v18  ;;  %v372_v44 = vmul.f32 %v369_v38, %v224_v19  ;;  %v400_v46 = vmul.f32 %v398_v42, %v223_v18  ;;  %v401_v47 = vmul.f32 %v398_v42, %v224_v19 }
  0x9a   : > { %v420_v35 = vpop.permute.xlu0 %419  ;;  %v449_v49 = vpop.permute.xlu1 %448 }
  0x9b   : > { %319 = vrot.lane.b32.xlu0 %v314_v32, %s826_s16  ;;  %317 = vrot.lane.b32.xlu1 %v313_v31, %s826_s16  ;;  %v427_v48 = vrot.slane %v420_v35, %v950_v17  ;;  %v456_v50 = vrot.slane %v449_v49, %v950_v17 }
  0x9d   : > { %v429_v51 = vmul.f32 %v427_v48, %v223_v18  ;;  %v430_v52 = vmul.f32 %v427_v48, %v224_v19  ;;  %v458_v53 = vmul.f32 %v456_v50, %v223_v18  ;;  %v459_v54 = vmul.f32 %v456_v50, %v224_v19 }
  0x9e   : > { %v229_v40 = vpop.permute.xlu0 %228  ;;  %v974_v59 = vpop.permute.xlu1 %476 }
  0x9f   : > { %v236_v41 = vrot.slane %v229_v40, %v950_v17  ;;  %348 = vrot.lane.b32.xlu0 %v343_v37, %s827_s17  ;;  %346 = vrot.lane.b32.xlu1 %v342_v36, %s827_s17  ;;  %s1002_s17 = scalar_lea.hbm %s1051_s5, %s696_s12 }
  0xa1   : > { %v962_v45 = vmul.f32 %v236_v41, %v223_v18 }
  0xa3   : > { %377 = vrot.lane.b32.xlu0 %v372_v44, %s828_s23  ;;  %375 = vrot.lane.b32.xlu1 %v371_v43, %s828_s23  ;;  %s757_s23 = scalar_lea.vmem %s1004_s14, 256 }
  0xa4   : > { %p758_p11 = scmp.ne.s32.totalorder %s1004_s14, %s757_s23 }
  0xa6   : > { %p759_p12 = pnand %p758_p11, %p903_p5 }
  0xa7   : > { %406 = vrot.lane.b32.xlu0 %v401_v47, %s829_s25  ;;  %404 = vrot.lane.b32.xlu1 %v400_v46, %s829_s25  ;;  %s834_s25 = smov [#allocation2]  }
  0xa8   : > { %p760_p13 = pneg %p759_p12 }
  0xab   : > { %433 = vrot.lane.b32.xlu0 %v429_v51, %s830_s26  ;;  %435 = vrot.lane.b32.xlu1 %v430_v52, %s830_s26  ;;  %s761_s26 = sshll.u32 %s834_s25, 4  ;;  %s762_s26 = int_to_ptr.vmem [resolvable:$false] %s761_s26 }
  0xac   : > { %p764_p0 = scmp.lt.s32.totalorder %s1004_s14, %s762_s26 }
  0xaf   : > { %462 = vrot.lane.b32.xlu0 %v458_v53, %s831_s30  ;;  %464 = vrot.lane.b32.xlu1 %v459_v54, %s831_s30  ;;  %v484_v53 = vrot.slane %v974_v59, %v950_v17  ;;  %v573_v59 = vsub.s32 3, %v947_v16  ;;  %s763_s30 = scalar_lea.vmem %s762_s26, 512 }
  0xb0   : > { %p765_p1 = scmp.lt.s32.totalorder %s763_s30, %s757_s23 }
  0xb2   : > { %p766_p2 = por %p765_p1, %p764_p0 }
  0xb3   : > { %491 = vperm.xlu0 %750, %v488_v55   ;;  %516 = vperm.xlu1 %752, %v488_v55  }
  0xb4   : > { %p767_p3 = pnand %p766_p2, %p760_p13 }
  0xb7   : > { %753 = vset.pattern.permute.xlu0 %v832_v56  ;;  %754 = vset.pattern.permute.xlu1 %v833_v57  ;;  %v497_v56 = vsub.s32 0, %v947_v16 }
  0xb8   : > { %542 = vperm.xlu0 %753, %v488_v55   ;;  %568 = vperm.xlu1 %754, %v488_v55  }
  0xbc   : > { %755 = vset.pattern.permute.xlu1 %v821_v2  ;;  %756 = vset.pattern.permute.xlu0 %v821_v2 }
  0xbd   : > { %596 = vperm.xlu1 %755, %v593_v58   ;;  %v501_v58 = vsub.s32 4, %v947_v16 }
 0x105   : > { %v261_v60 = vpop.permute.xlu0 %260  ;;  %v259_v61 = vpop.permute.xlu1 %258 }
 0x106   : > { %v263_v3 = vrot.slane %v261_v60, 4  ;;  %v262_v4 = vrot.slane %v259_v61, 4  ;;  %v521_v60 = vsub.s32 1, %v947_v16 }
 0x108   : > { %v265_v9 = vsel %vm264_vm0, %v262_v4, %v263_v3  ;;  %v577_v4 = vsub.s32 7, %v947_v16 }
 0x109   : > { %v291_v62 = vpop.permute.xlu0 %290  ;;  %v289_v63 = vpop.permute.xlu1 %288  ;;  %v267_v14 = vsel %vm266_vm1, %v259_v61, %v265_v9  ;;  %v525_v61 = vsub.s32 5, %v947_v16 }
 0x10a   : > { %v293_v5 = vrot.slane %v291_v62, 4  ;;  %v292_v6 = vrot.slane %v289_v63, 4  ;;  %v269_v23 = vadd.f32 %v267_v14, %v962_v45  ;;  %v547_v62 = vsub.s32 2, %v947_v16 }
 0x10c   : > { %v294_v11 = vsel %vm264_vm0, %v292_v6, %v293_v5 }
 0x10d   : > { %v320_v0 = vpop.permute.xlu0 %319  ;;  %v318_v1 = vpop.permute.xlu1 %317  ;;  %v296_v22 = vsel %vm295_vm2, %v289_v63, %v294_v11  ;;  %v551_v63 = vsub.s32 6, %v947_v16 }
 0x10e   : > { %v322_v2 = vrot.slane %v320_v0, 4  ;;  %v321_v10 = vrot.slane %v318_v1, 4  ;;  %v298_v28 = vadd.f32 %v296_v22, %v269_v23 }
 0x110   : > { %v323_v19 = vsel %vm264_vm0, %v321_v10, %v322_v2 }
 0x111   : > { %v349_v7 = vpop.permute.xlu0 %348  ;;  %v347_v8 = vpop.permute.xlu1 %346  ;;  %v325_v25 = vsel %vm324_vm3, %v318_v1, %v323_v19 }
 0x112   : > { %v351_v12 = vrot.slane %v349_v7, 4  ;;  %v350_v13 = vrot.slane %v347_v8, 4  ;;  %v327_v33 = vadd.f32 %v325_v25, %v298_v28 }
 0x114   : > { %v352_v24 = vsel %vm264_vm0, %v350_v13, %v351_v12 }
 0x115   : > { %v378_v15 = vpop.permute.xlu0 %377  ;;  %v376_v18 = vpop.permute.xlu1 %375  ;;  %v354_v32 = vsel %vm353_vm4, %v347_v8, %v352_v24 }
 0x116   : > { %v380_v20 = vrot.slane %v378_v15, 4  ;;  %v379_v21 = vrot.slane %v376_v18, 4  ;;  %v356_v38 = vadd.f32 %v354_v32, %v327_v33 }
 0x118   : > { %v381_v29 = vsel %vm264_vm0, %v379_v21, %v380_v20 }
 0x119   : > { %v407_v26 = vpop.permute.xlu0 %406  ;;  %v405_v27 = vpop.permute.xlu1 %404  ;;  %v383_v35 = vsel %vm382_vm5, %v376_v18, %v381_v29 }
 0x11a   : > { %v409_v30 = vrot.slane %v407_v26, 4  ;;  %v408_v31 = vrot.slane %v405_v27, 4  ;;  %v385_v42 = vadd.f32 %v383_v35, %v356_v38 }
 0x11c   : > { %v410_v34 = vsel %vm264_vm0, %v408_v31, %v409_v30 }
 0x11d   : > { %v434_v36 = vpop.permute.xlu0 %433  ;;  %v436_v37 = vpop.permute.xlu1 %435  ;;  %v412_v41 = vsel %vm411_vm6, %v405_v27, %v410_v34 }
 0x11e   : > { %v437_v39 = vrot.slane %v434_v36, 4  ;;  %v438_v40 = vrot.slane %v436_v37, 4  ;;  %v414_v47 = vadd.f32 %v412_v41, %v385_v42 }
 0x120   : > { %v439_v43 = vsel %vm264_vm0, %v437_v39, %v438_v40 }
 0x121   : > { %v441_v44 = vsel %vm440_vm7, %v434_v36, %v439_v43  ;;  %v463_v45 = vpop.permute.xlu0 %462  ;;  %v465_v46 = vpop.permute.xlu1 %464 }
 0x122   : > { %v466_v48 = vrot.slane %v463_v45, 4  ;;  %v467_v49 = vrot.slane %v465_v46, 4  ;;  %v443_v50 = vadd.f32 %v441_v44, %v414_v47 }
 0x124   : > { %v468_v51 = vsel %vm264_vm0, %v466_v48, %v467_v49 }
 0x125   : > { %v470_v52 = vsel %vm469_vm8, %v463_v45, %v468_v51 }
 0x126   : > { %v472_v54 = vadd.f32 %v470_v52, %v443_v50 }
 0x128   : > { %v486_v55 = vadd.f32 %v484_v53, %v472_v54 }
 0x12a   : > { %v487_v57 = vmax.f32 %v486_v55, 0.0 }
 0x12c   : > { %v498_v0 = vrot.slane %v487_v57, %v497_v56  ;;  %v502_v1 = vrot.slane %v487_v57, %v501_v58  ;;  %v522_v3 = vrot.slane %v487_v57, %v521_v60  ;;  %v526_v17 = vrot.slane %v487_v57, %v525_v61 }
 0x12d   : > { %v548_v5 = vrot.slane %v487_v57, %v547_v62  ;;  %v552_v6 = vrot.slane %v487_v57, %v551_v63  ;;  %v574_v12 = vrot.slane %v487_v57, %v573_v59  ;;  %v578_v13 = vrot.slane %v487_v57, %v577_v4 }
 0x12e   : > { %v508_v8 = vrot.slane %v498_v0, %v497_v56  ;;  %v512_v9 = vrot.slane %v502_v1, %v497_v56  ;;  %v532_v10 = vrot.slane %v522_v3, %v521_v60  ;;  %v536_v11 = vrot.slane %v526_v17, %v521_v60 }
 0x12f   : > { %v558_v16 = vrot.slane %v548_v5, %v547_v62  ;;  %v562_v20 = vrot.slane %v552_v6, %v547_v62  ;;  %v584_v23 = vrot.slane %v574_v12, %v573_v59  ;;  %v588_v24 = vrot.slane %v578_v13, %v573_v59 }
 0x132   : > { %v492_v7 = vpop.permute.xlu0 %491  ;;  %v517_v2 = vpop.permute.xlu1 %516 }
 0x133   : > { %v513_v14 = vmul.f32 %v508_v8, %v492_v7  ;;  %v514_v15 = vmul.f32 %v512_v9, %v492_v7  ;;  %v537_v18 = vmul.f32 %v532_v10, %v517_v2  ;;  %v538_v19 = vmul.f32 %v536_v11, %v517_v2 }
 0x135   : > { %v539_v25 = vadd.f32 %v537_v18, %v513_v14  ;;  %v540_v26 = vadd.f32 %v538_v19, %v514_v15 }
 0x137   : > { %v543_v21 = vpop.permute.xlu0 %542  ;;  %v569_v22 = vpop.permute.xlu1 %568 }
 0x138   : > { %v563_v27 = vmul.f32 %v558_v16, %v543_v21  ;;  %v564_v28 = vmul.f32 %v562_v20, %v543_v21  ;;  %v589_v31 = vmul.f32 %v584_v23, %v569_v22  ;;  %v590_v32 = vmul.f32 %v588_v24, %v569_v22 }
 0x13a   : > { %v565_v29 = vadd.f32 %v563_v27, %v539_v25  ;;  %v566_v30 = vadd.f32 %v564_v28, %v540_v26 }
 0x13c   : > { %v597_v33 = vpop.permute.xlu1 %596  ;;  %v591_v34 = vadd.f32 %v589_v31, %v565_v29  ;;  %v592_v35 = vadd.f32 %v590_v32, %v566_v30 }
 0x13e   : > { %v599_v36 = vadd.f32 %v597_v33, %v591_v34  ;;  %v600_v37 = vadd.f32 %v597_v33, %v592_v35 }
 0x140   : > { %601 = vst [vmem:[%s217_s13] sm:$0xff] %v599_v36  ;;  %602 = vst [vmem:[%s217_s13 + $0x8] sm:$0xff] %v600_v37 }
 0x141   : > { %770 = shalt.err (!%p767_p3)
}
 0x142   : > { %s771_s6 = scalar_lea.hbm %s1002_s17, 256  ;;  %s775_s9 = scalar_lea.hbm %s1051_s5, 512 }
 0x143   : > { %p772_p4 = scmp.ne.s32.totalorder %s1002_s17, %s771_s6  ;;  %p776_p9 = scmp.lt.u32.totalorder %s1002_s17, %s1051_s5 }
 0x144   : > { %p777_p10 = scmp.lt.u32.totalorder %s775_s9, %s771_s6  ;;  %p779_p12 = scmp.lt.u32.totalorder %s771_s6, %s1002_s17 }
 0x145   : > { %p773_p7 = pnand %p772_p4, %p903_p5 }
 0x146   : > { %p778_p11 = por %p777_p10, %p776_p9 }
 0x147   : > { %p774_p8 = pneg %p773_p7 }
 0x148   : > { %p780_p13 = por %p779_p12, %p778_p11 }
 0x14a   : > { %p781_p0 = pnand %p780_p13, %p774_p8 }
 0x14c   : > { %784 = shalt.err (!%p781_p0)
}
 0x14d   : > { %698 = dma.vmem_to_hbm [thread:$0]  (%p903_p5), %s1004_s14, 256, %s1002_s17, %s604_s22  }
 0x14e PF: > { %p704_p1 = scmp.ge.s32.totalorder %s819_s21, 2  ;;  %s630_s12 = sand.u32 1, %s807_s18  }
 0x14f   : > { %s631_s13 = scalar_lea.sflag [#allocation3], %s630_s12 }
 0x150   : > { %p701_p2 = pnand %p704_p1, %p907_p6 }
 0x152   : > { %802 = dma.done.wait (!%p701_p2), %s631_s13, 256  }
 0x153   : > { %804 = vsyncadd (!%p701_p2), %s631_s13, 4294967040  ;;  %p15_p3 = scmp.ge.s32.totalorder %s890_s24, 4   ;;  %s1054_s18 = smov %s811_s19 }
 0x154   : > { %s1055_s19 = smov %s815_s20  ;;  %s1056_s20 = smov %s901_s27 }
 0x155   : > { %s1057_s21 = smov %s890_s24  ;;  %17 = sbr.rel (!%p15_p3) target bundleno = 3 (0x3), region = 83 }
 0x15c   :  { %636 = vsyncpa [#allocation3], 1 }
 0x15d   :  { %638 = vsyncpa [#allocation3 + $0x1], 1 }

</bundles_post_ra>
